<compile_context>
chip_gen: v6e
topology: v6e:2x2x1
jax: 0.10.0
libtpu: 0.0.40
codegen_flags: <defaults>
</compile_context>

<pallas_src>
import jax
import jax.numpy as jnp
from jax.experimental import pallas as pl
from jax.experimental.pallas import tpu as pltpu

# Minimum sublane tile per element size (bytes -> sublanes).
_MIN_SUBLANES = {4: 8, 2: 16, 1: 32}

TINY_BYPASS_BYTES = 256 * 1024       # below this, XLA fused op wins outright
SINGLE_BLOCK_BYTES = 512 * 1024      # below this, one block / no pipelining
TARGET_BLOCK_BYTES = 4 * 1024 * 1024  # ~4 MiB blocks amortize per-step overhead


def _sigmoid_kernel(x_ref, o_ref):
    # lax.logistic: transcendental routed to the EUP slot, VALU stays free.
    o_ref[...] = jax.nn.sigmoid(x_ref[...])


def _round_up(v: int, m: int) -> int:
    return ((v + m - 1) // m) * m


def _choose_lane_width(n: int):
    """Widest lane-dense last dim that divides the flat size (no pad copy)."""
    for w in (1024, 512, 256, 128):
        if n % w == 0:
            return w
    return None


def ilee_forward(x: jax.Array, *, force_pallas: bool = False) -> jax.Array:
    """Applies sigmoid elementwise; Pallas TPU kernel for HBM-sized inputs."""
    n = x.size
    itemsize = jnp.dtype(x.dtype).itemsize
    total_bytes = n * itemsize
    sub_min = _MIN_SUBLANES.get(itemsize)
    lane_w = _choose_lane_width(n) if n else None

    # Tiny inputs: kernel launch overhead dominates -> fused XLA elementwise op.
    if (not force_pallas) and total_bytes < TINY_BYPASS_BYTES:
        return jax.nn.sigmoid(x)

    # Shapes/dtypes that can't map to a lane-dense slab without a whole-array
    # pad copy (n not a multiple of 128, or 8-byte dtypes): fall back.
    # TODO(synk): could run the kernel on the 128-aligned prefix and a tiny
    # tail path, but the stitch copy costs as much as the fallback saves.
    if sub_min is None or lane_w is None or n == 0:
        return jax.nn.sigmoid(x)

    rows = n // lane_w
    x2d = x.reshape(rows, lane_w)  # contiguous reshape: bitcast, no HBM copy

    if total_bytes <= SINGLE_BLOCK_BYTES or rows < 2 * sub_min:
        # Single full-array block: no per-step pipeline overhead.
        block_rows = rows
    else:
        # >=2 roughly even blocks (keeps both v7x TensorCores busy), capped at
        # ~4 MiB per block.
        max_block_rows = max(
            sub_min,
            (TARGET_BLOCK_BYTES // (lane_w * itemsize)) // sub_min * sub_min)
        half_rows = _round_up(pl.cdiv(rows, 2), sub_min)
        block_rows = min(max_block_rows, half_rows)

    grid_steps = pl.cdiv(rows, block_rows)  # partial last block is masked
    block_bytes = block_rows * lane_w * itemsize
    # Cover in+out double-buffering (4 blocks) plus headroom; stays within the
    # physical VMEM of every chip (v7x: 64 MiB) and within v5e's 128 MiB.
    vmem_limit = min(32 << 20, max(16 << 20, 4 * block_bytes + (4 << 20)))

    out2d = pl.pallas_call(
        _sigmoid_kernel,
        out_shape=jax.ShapeDtypeStruct((rows, lane_w), x.dtype),
        grid=(grid_steps,),
        in_specs=[pl.BlockSpec((block_rows, lane_w), lambda i: (i, 0))],
        out_specs=pl.BlockSpec((block_rows, lane_w), lambda i: (i, 0)),
        compiler_params=pltpu.CompilerParams(
            dimension_semantics=("parallel",),
            vmem_limit_bytes=vmem_limit),
    )(x2d)

    return out2d.reshape(x.shape)


if __name__ == "__main__":
    key = jax.random.PRNGKey(0)
    # NCHW, small shapes: batch=2, channels=4, spatial=16x16
    x = jax.random.normal(key, (2, 4, 16, 16), dtype=jnp.float32)

    # Production path: tiny input -> fused XLA bypass.
    y = ilee_forward(x)
    # Force the Pallas kernel path on the same small input to exercise it.
    y_kernel = ilee_forward(x, force_pallas=True)
    jax.block_until_ready((y, y_kernel))

    y_ref = jax.nn.sigmoid(x)
    assert y.shape == x.shape and y.dtype == x.dtype
    assert y_kernel.shape == x.shape and y_kernel.dtype == x.dtype
    assert jnp.allclose(y, y_ref, atol=1e-6, rtol=1e-6)
    assert jnp.allclose(y_kernel, y_ref, atol=1e-6, rtol=1e-6)

    # Also exercise the multi-block pipelined path (grid > 1).
    x_big = jax.random.normal(jax.random.PRNGKey(1), (1024, 1024),
                              dtype=jnp.float32)
    y_big = ilee_forward(x_big)
    jax.block_until_ready(y_big)
    assert jnp.allclose(y_big, jax.nn.sigmoid(x_big), atol=1e-6, rtol=1e-6)

    print("KERNEL_OK")
</pallas_src>

<mosaic_0001>
module attributes {stable_mosaic.version = 11 : i64} {
  func.func @_sigmoid_kernel(%arg0: i32, %arg1: memref<2x1024xf32, #tpu.memory_space<vmem>>, %arg2: memref<2x1024xf32, #tpu.memory_space<vmem>>) attributes {dimension_semantics = [#tpu.dimension_semantics<parallel>], iteration_bounds = array<i64: 1>, scalar_prefetch = 0 : i64, scratch_operands = 0 : i64, tpu.core_type = #tpu.core_type<tc>, window_params = [{transform_indices = @transform_0, window_bounds = array<i64: 2, 1024>}, {transform_indices = @transform_1, window_bounds = array<i64: 2, 1024>}]} {
    %c0 = arith.constant 0 : index
    %c0_0 = arith.constant 0 : index
    %0 = vector.load %arg1[%c0, %c0_0] : memref<2x1024xf32, #tpu.memory_space<vmem>>, vector<2x1024xf32>
    %1 = arith.negf %0 : vector<2x1024xf32>
    %2 = math.exp %1 : vector<2x1024xf32>
    %cst = arith.constant 1.000000e+00 : f32
    %3 = vector.broadcast %cst : f32 to vector<2x1024xf32>
    %4 = arith.addf %3, %2 : vector<2x1024xf32>
    %5 = arith.divf %3, %4 : vector<2x1024xf32>
    %c0_1 = arith.constant 0 : index
    %c0_2 = arith.constant 0 : index
    %6 = vector.load %arg2[%c0_1, %c0_2] : memref<2x1024xf32, #tpu.memory_space<vmem>>, vector<2x1024xf32>
    tpu.vector_store %arg2[%c0_1, %c0_2], %5 {strides = array<i32>} : memref<2x1024xf32, #tpu.memory_space<vmem>>, vector<2x1024xf32>,
    return
  }
  func.func @transform_0(%arg0: i32) -> (i32, i32) {
    %c0_i32 = arith.constant 0 : i32
    %c0_i32_0 = arith.constant 0 : i32
    return %arg0, %c0_i32 : i32, i32
  }
  func.func @transform_1(%arg0: i32) -> (i32, i32) {
    %c0_i32 = arith.constant 0 : i32
    %c0_i32_0 = arith.constant 0 : i32
    return %arg0, %c0_i32 : i32, i32
  }
}

</mosaic_0001>

<bundles_post_ra>
// kernel: tpu_custom_call.1
= control target key start
LH: loop header
LB: loop body
LE: loop exit
PB: predicated region body
PF: predicated region fallthrough
CT: control target
= control target key end

     0   :  { %6 = vsyncpa [#allocation3], 0  ;;  %s126_s0 = inlined_call_operand.hbm [shape: f32[2,1024], index: 0, kind: input, shape index: {}]   ;;  %s127_s1 = inlined_call_operand.hbm [shape: f32[2,1024], index: 1, kind: output, shape index: {}]  }
   0x1   :  { %7 = vsyncpa [#allocation4], 0  ;;  %s108_s6 = smov [#allocation2]  }
   0x2   :  { %s14_s7 = sshll.u32 %s108_s6, 4  ;;  %s15_s7 = int_to_ptr.vmem [resolvable:$true] %s14_s7 }
   0x3   :  { %s72_s8 = scalar_lea.vmem %s15_s7, 256  ;;  %p77_p1 = scmp.lt.s32.totalorder %s15_s7, %s15_s7 }
   0x4   :  { %p73_p0 = scmp.ne.s32.totalorder %s15_s7, %s72_s8  ;;  %p78_p2 = scmp.lt.s32.totalorder %s72_s8, %s72_s8 }
   0x6   :  { %p79_p3 = por %p78_p2, %p77_p1 }
   0x8   :  { %p80_p4 = pnand %p79_p3, %p73_p0 }
   0xa   :  { %83 = shalt.err (!%p80_p4)
}
   0xb   :  { %17 = dma.hbm_to_vmem [thread:$0]  %s126_s0, 256, %s15_s7, [#allocation3]  }
   0xc   :  { %104 = dma.done.wait [#allocation3], 256  }
   0xd   :  { %105 = vsyncadd [#allocation3], 4294967040  ;;  %v21_v0 = vld [vmem:[#allocation2] sm:$0xff]  ;;  %v22_v1 = vld [vmem:[#allocation2 + $0x8] sm:$0xff]  ;;  %s109_s11 = smov [#allocation5]  }
   0xe   :  { %v52_v2 = vmul.f32 -1.442695, %v21_v0  ;;  %v53_v3 = vmul.f32 -1.442695, %v22_v1  ;;  %s43_s12 = sshll.u32 %s109_s11, 4  ;;  %s44_s12 = int_to_ptr.vmem [resolvable:$true] %s43_s12 }
   0xf   :  { %s84_s0 = scalar_lea.vmem %s44_s12, 256  ;;  %p89_p6 = scmp.lt.s32.totalorder %s44_s12, %s44_s12 }
  0x10   :  { %56 = vpow2.f32 %v52_v2  ;;  %p85_p5 = scmp.ne.s32.totalorder %s44_s12, %s84_s0  ;;  %p90_p7 = scmp.lt.s32.totalorder %s84_s0, %s84_s0 }
  0x11   :  { %58 = vpow2.f32 %v53_v3 }
  0x12   :  { %p91_p8 = por %p90_p7, %p89_p6 }
  0x14   :  { %p92_p9 = pnand %p91_p8, %p85_p5 }
  0x1d   :  { %v57_v4 = vpop.eup %56 }
  0x1e   :  { %v59_v5 = vpop.eup %58  ;;  %v29_v6 = vadd.f32 1.0, %v57_v4 }
  0x1f   :  { %v30_v7 = vadd.f32 1.0, %v59_v5 }
  0x20   :  { %60 = vrcp.f32 %v29_v6 }
  0x21   :  { %62 = vrcp.f32 %v30_v7 }
  0x2d   :  { %v61_v8 = vpop.eup %60 }
  0x2e   :  { %v63_v9 = vpop.eup %62  ;;  %35 = vst [vmem:[#allocation5] sm:$0xff] %v61_v8 }
  0x2f   :  { %36 = vst [vmem:[#allocation5 + $0x8] sm:$0xff] %v63_v9 }
  0x30   :  { %95 = shalt.err (!%p92_p9)
}
  0x31   :  { %46 = dma.vmem_to_hbm [thread:$0]  %s44_s12, 256, %s127_s1, [#allocation4]  }
  0x32   :  { %106 = dma.done.wait [#allocation4], 256  }
  0x33   :  { %107 = vsyncadd [#allocation4], 4294967040 }
  0x34   :  { %50 = vsyncpa [#allocation3], 1 }
  0x35   :  { %51 = vsyncpa [#allocation4], 1 }

</bundles_post_ra>
